<compile_context>
chip_gen: v6e
topology: v6e:2x2x1
jax: 0.10.0
libtpu: 0.0.40
codegen_flags: <defaults>
</compile_context>

<pallas_src>
import functools
import math

import jax
import jax.numpy as jnp
from jax.experimental import pallas as pl
from jax.experimental.pallas import tpu as pltpu


def _round_up(a, b):
    return ((a + b - 1) // b) * b


# --------------------------------------------------------------------------- #
# Projection matmul: out = x @ w_t   (w_t is the pre-transposed nn.Linear weight)
# --------------------------------------------------------------------------- #
def _matmul_kernel(x_ref, w_ref, o_ref, acc_ref):
    @pl.when(pl.program_id(2) == 0)
    def _():
        acc_ref[...] = jnp.zeros_like(acc_ref)

    acc_ref[...] += jnp.dot(x_ref[...], w_ref[...],
                            preferred_element_type=jnp.float32)

    @pl.when(pl.program_id(2) == pl.num_programs(2) - 1)
    def _():
        o_ref[...] = acc_ref[...].astype(o_ref.dtype)


def linear(x2d, w_t, *, out_dtype=None, compute_dtype=jnp.bfloat16):
    """x2d: [M, K]; w_t: [K, N]. Returns [M, N] in out_dtype."""
    M, K = x2d.shape
    K2, N = w_t.shape
    assert K == K2
    out_dtype = x2d.dtype if out_dtype is None else out_dtype

    xc = x2d.astype(compute_dtype)
    wc = w_t.astype(compute_dtype)

    # Token tile: at least one full MXU M dim when possible; pad instead of assert.
    tm = min(256, _round_up(M, 8))
    m_pad = _round_up(M, tm)
    if m_pad != M:
        xc = jnp.pad(xc, ((0, m_pad - M), (0, 0)))

    tn = N if N <= 1024 else 1024
    assert N % tn == 0, "output features must be <=1024 or a multiple of 1024"
    tk = K if K <= 2048 else 2048
    assert K % tk == 0, "input features must be <=2048 or a multiple of 2048"

    grid = (m_pad // tm, N // tn, K // tk)
    itemsize = jnp.dtype(compute_dtype).itemsize

    out = pl.pallas_call(
        _matmul_kernel,
        out_shape=jax.ShapeDtypeStruct((m_pad, N), out_dtype),
        grid_spec=pltpu.PrefetchScalarGridSpec(
            num_scalar_prefetch=0,
            grid=grid,
            in_specs=[
                pl.BlockSpec((tm, tk), lambda i, j, k: (i, k)),
                pl.BlockSpec((tk, tn), lambda i, j, k: (k, j)),
            ],
            out_specs=pl.BlockSpec((tm, tn), lambda i, j, k: (i, j)),
            scratch_shapes=[pltpu.VMEM((tm, tn), jnp.float32)],
        ),
        compiler_params=pltpu.CompilerParams(
            dimension_semantics=("parallel", "parallel", "arbitrary"),
            vmem_limit_bytes=64 * 1024 * 1024),
        cost_estimate=pl.CostEstimate(
            flops=2 * m_pad * N * K,
            transcendentals=0,
            bytes_accessed=(m_pad * K + K * N + m_pad * N) * itemsize),
    )(xc, wc)
    return out[:M] if m_pad != M else out


# --------------------------------------------------------------------------- #
# Flash attention forward (online softmax), GQA-aware, additive mask.
# --------------------------------------------------------------------------- #
def _flash_attn_kernel(q_ref, k_ref, v_ref, mask_ref, o_ref,
                       m_sc, l_sc, acc_sc, *, scale):
    ki = pl.program_id(2)

    @pl.when(ki == 0)
    def _():
        m_sc[...] = jnp.full_like(m_sc, -jnp.inf)
        l_sc[...] = jnp.zeros_like(l_sc)
        acc_sc[...] = jnp.zeros_like(acc_sc)

    s = jax.lax.dot_general(
        q_ref[...], k_ref[...], (((1,), (1,)), ((), ())),
        preferred_element_type=jnp.float32) * scale
    s = s + mask_ref[...]

    m_prev = m_sc[...]
    m_new = jnp.maximum(jnp.maximum(m_prev, jnp.max(s, axis=-1, keepdims=True)),
                        jnp.float32(-1e30))
    alpha = jnp.exp(m_prev - m_new)
    p = jnp.exp(s - m_new)
    l_sc[...] = alpha * l_sc[...] + jnp.sum(p, axis=-1, keepdims=True)
    acc_sc[...] = alpha * acc_sc[...] + jnp.dot(
        p.astype(v_ref.dtype), v_ref[...], preferred_element_type=jnp.float32)
    m_sc[...] = m_new

    @pl.when(ki == pl.num_programs(2) - 1)
    def _():
        o_ref[...] = (acc_sc[...] *
                      pl.reciprocal(l_sc[...], approx=True)).astype(o_ref.dtype)


def _attention(q, k, v, mask):
    """q: [B,Sq,H,D]; k/v: [B,Skv,Hkv,D]; mask: [Sq,Skv] additive or None.
    Returns [B,Sq,H,D]."""
    B, Sq, H, Dh = q.shape
    _, Skv, Hkv, _ = k.shape
    assert H % Hkv == 0
    n_rep = H // Hkv
    scale = 1.0 / math.sqrt(Dh)

    qf = q.transpose(0, 2, 1, 3).reshape(B * H, Sq, Dh)
    kf = k.transpose(0, 2, 1, 3).reshape(B * Hkv, Skv, Dh)
    vf = v.transpose(0, 2, 1, 3).reshape(B * Hkv, Skv, Dh)

    mask2d = (jnp.zeros((Sq, Skv), jnp.float32) if mask is None
              else mask.astype(jnp.float32))

    # Pad to tile-friendly / lane-dense shapes instead of asserting divisibility.
    tq = min(256, _round_up(Sq, 8))
    sq_pad = _round_up(Sq, tq)
    tk = min(512, _round_up(Skv, 128))
    skv_pad = _round_up(Skv, tk)

    if sq_pad != Sq:
        qf = jnp.pad(qf, ((0, 0), (0, sq_pad - Sq), (0, 0)))
    if skv_pad != Skv:
        kf = jnp.pad(kf, ((0, 0), (0, skv_pad - Skv), (0, 0)))
        vf = jnp.pad(vf, ((0, 0), (0, skv_pad - Skv), (0, 0)))
    maskp = jnp.pad(mask2d, ((0, sq_pad - Sq), (0, skv_pad - Skv)),
                    constant_values=-1e30)

    BH = B * H
    grid = (BH, sq_pad // tq, skv_pad // tk)

    def kv_index(bh, qi, ki):
        # GQA: query head h uses kv head h // n_rep of the same batch entry.
        return ((bh // H) * Hkv + (bh % H) // n_rep, ki, 0)

    out = pl.pallas_call(
        functools.partial(_flash_attn_kernel, scale=scale),
        out_shape=jax.ShapeDtypeStruct((BH, sq_pad, Dh), q.dtype),
        grid_spec=pltpu.PrefetchScalarGridSpec(
            num_scalar_prefetch=0,
            grid=grid,
            in_specs=[
                pl.BlockSpec((None, tq, Dh), lambda bh, qi, ki: (bh, qi, 0)),
                pl.BlockSpec((None, tk, Dh), kv_index),
                pl.BlockSpec((None, tk, Dh), kv_index),
                pl.BlockSpec((tq, tk), lambda bh, qi, ki: (qi, ki)),
            ],
            out_specs=pl.BlockSpec((None, tq, Dh),
                                   lambda bh, qi, ki: (bh, qi, 0)),
            scratch_shapes=[
                pltpu.VMEM((tq, 1), jnp.float32),
                pltpu.VMEM((tq, 1), jnp.float32),
                pltpu.VMEM((tq, Dh), jnp.float32),
            ],
        ),
        compiler_params=pltpu.CompilerParams(
            dimension_semantics=("parallel", "parallel", "arbitrary"),
            vmem_limit_bytes=64 * 1024 * 1024),
        cost_estimate=pl.CostEstimate(
            flops=4 * BH * sq_pad * skv_pad * Dh,
            transcendentals=BH * sq_pad * skv_pad,
            bytes_accessed=(2 * BH * sq_pad * Dh * 2
                            + 2 * B * Hkv * skv_pad * Dh * 2
                            + sq_pad * skv_pad * 4)),
    )(qf, kf, vf, maskp)

    out = out[:, :Sq, :]
    return out.reshape(B, H, Sq, Dh).transpose(0, 2, 1, 3)


# --------------------------------------------------------------------------- #
# RoPE (interleaved real/imag pairs, matching torch view_as_complex semantics)
# --------------------------------------------------------------------------- #
def _apply_rope(x, cos, sin):
    """x: [B, S, H, D]; cos/sin: [S, D//2]."""
    orig_dtype = x.dtype
    xf = x.astype(jnp.float32)
    xr, xi = xf[..., 0::2], xf[..., 1::2]
    c = cos[None, :, None, :].astype(jnp.float32)
    s = sin[None, :, None, :].astype(jnp.float32)
    yr = xr * c - xi * s
    yi = xr * s + xi * c
    return jnp.stack([yr, yi], axis=-1).reshape(x.shape).astype(orig_dtype)


# --------------------------------------------------------------------------- #
# Functional Llama3Attention forward
# --------------------------------------------------------------------------- #
def llama3_attention(x, start_pos, freqs_cos, freqs_sin, mask,
                     wq, wk, wv, wo, cache_k, cache_v,
                     *, n_heads, n_kv_heads, compute_dtype=jnp.bfloat16):
    """Returns (output [B,S,dim] in x.dtype, updated cache_k, updated cache_v)."""
    B, S, dim = x.shape
    head_dim = dim // n_heads

    x2d = x.reshape(B * S, dim)
    xq = linear(x2d, wq.T, out_dtype=compute_dtype, compute_dtype=compute_dtype)
    xk = linear(x2d, wk.T, out_dtype=compute_dtype, compute_dtype=compute_dtype)
    xv = linear(x2d, wv.T, out_dtype=compute_dtype, compute_dtype=compute_dtype)

    xq = xq.reshape(B, S, n_heads, head_dim)
    xk = xk.reshape(B, S, n_kv_heads, head_dim)
    xv = xv.reshape(B, S, n_kv_heads, head_dim)

    xq = _apply_rope(xq, freqs_cos, freqs_sin)
    xk = _apply_rope(xk, freqs_cos, freqs_sin)

    # TODO(synk): RoPE and the KV-cache scatter are plain jnp ops here; they could be
    # fused into the projection kernel (input_output_aliases on the cache) if needed.
    cache_k = jax.lax.dynamic_update_slice(
        cache_k, xk.astype(cache_k.dtype), (0, start_pos, 0, 0))
    cache_v = jax.lax.dynamic_update_slice(
        cache_v, xv.astype(cache_v.dtype), (0, start_pos, 0, 0))

    kv_len = start_pos + S
    keys = cache_k[:B, :kv_len].astype(compute_dtype)
    values = cache_v[:B, :kv_len].astype(compute_dtype)

    attn = _attention(xq, keys, values, mask)              # [B, S, H, Dh]
    attn2d = attn.reshape(B * S, n_heads * head_dim)
    out = linear(attn2d, wo.T, out_dtype=x.dtype, compute_dtype=compute_dtype)
    return out.reshape(B, S, dim), cache_k, cache_v


# --------------------------------------------------------------------------- #
# Helpers for the demo + pure-JAX f32 reference
# --------------------------------------------------------------------------- #
def _init_linear(key, out_features, in_features, dtype=jnp.float32):
    bound = 1.0 / math.sqrt(in_features)
    return jax.random.uniform(key, (out_features, in_features),
                              minval=-bound, maxval=bound, dtype=dtype)


def _precompute_freqs(head_dim, start_pos, seqlen, theta):
    inv = 1.0 / (theta ** (
        jnp.arange(0, head_dim, 2, dtype=jnp.float32)[: head_dim // 2] / head_dim))
    t = jnp.arange(start_pos, start_pos + seqlen, dtype=jnp.float32)
    ang = jnp.outer(t, inv)
    return jnp.cos(ang), jnp.sin(ang)


def _ref_forward(x, start_pos, cos, sin, mask, wq, wk, wv, wo,
                 n_heads, n_kv_heads):
    B, S, dim = x.shape
    hd = dim // n_heads
    n_rep = n_heads // n_kv_heads
    xq = (x @ wq.T).reshape(B, S, n_heads, hd)
    xk = (x @ wk.T).reshape(B, S, n_kv_heads, hd)
    xv = (x @ wv.T).reshape(B, S, n_kv_heads, hd)
    xq = _apply_rope(xq, cos, sin)
    xk = _apply_rope(xk, cos, sin)
    keys = jnp.repeat(xk, n_rep, axis=2)        # repeat_interleave over heads
    values = jnp.repeat(xv, n_rep, axis=2)
    q = xq.transpose(0, 2, 1, 3)
    k = keys.transpose(0, 2, 1, 3)
    v = values.transpose(0, 2, 1, 3)
    scores = jnp.einsum("bhqd,bhkd->bhqk", q, k) / math.sqrt(hd)
    if mask is not None:
        scores = scores + mask[None, None]
    probs = jax.nn.softmax(scores.astype(jnp.float32), axis=-1)
    out = jnp.einsum("bhqk,bhkd->bhqd", probs, v)
    out = out.transpose(0, 2, 1, 3).reshape(B, S, -1)
    return out @ wo.T


if __name__ == "__main__":
    # Small, module-consistent shapes (prefill step: start_pos=0, causal mask).
    batch, seq = 2, 8
    n_heads, n_kv_heads = 4, 2
    head_dim = 128
    dim = n_heads * head_dim          # 512
    max_batch, max_seq = 2, 16
    start_pos = 0
    rope_theta = 500000.0

    key = jax.random.PRNGKey(0)
    kx, kq, kk, kvk, ko = jax.random.split(key, 5)

    x = jax.random.normal(kx, (batch, seq, dim), dtype=jnp.float32)
    wq = _init_linear(kq, n_heads * head_dim, dim)       # [out, in] torch layout
    wk = _init_linear(kk, n_kv_heads * head_dim, dim)
    wv = _init_linear(kvk, n_kv_heads * head_dim, dim)
    wo = _init_linear(ko, dim, n_heads * head_dim)

    cos, sin = _precompute_freqs(head_dim, start_pos, seq, rope_theta)

    mask = jnp.triu(jnp.full((seq, seq), float("-inf"), dtype=jnp.float32), k=1)
    if start_pos > 0:
        mask = jnp.concatenate(
            [jnp.zeros((seq, start_pos), jnp.float32), mask], axis=1)

    cache_k = jnp.zeros((max_batch, max_seq, n_kv_heads, head_dim), jnp.bfloat16)
    cache_v = jnp.zeros((max_batch, max_seq, n_kv_heads, head_dim), jnp.bfloat16)

    out, cache_k, cache_v = llama3_attention(
        x, start_pos, cos, sin, mask, wq, wk, wv, wo, cache_k, cache_v,
        n_heads=n_heads, n_kv_heads=n_kv_heads)
    out = jax.block_until_ready(out)

    ref = _ref_forward(x, start_pos, cos, sin, mask, wq, wk, wv, wo,
                       n_heads, n_kv_heads)

    assert out.shape == (batch, seq, dim)
    max_err = float(jnp.max(jnp.abs(out - ref)))
    assert jnp.allclose(out, ref, atol=5e-2, rtol=5e-2), f"mismatch: {max_err}"
    print("KERNEL_OK")
</pallas_src>

<mosaic_0001>
module attributes {stable_mosaic.version = 11 : i64} {
  func.func @_matmul_kernel(%arg0: i32, %arg1: i32, %arg2: i32, %arg3: memref<16x512xbf16, #tpu.memory_space<vmem>>, %arg4: memref<512x512xbf16, #tpu.memory_space<vmem>>, %arg5: memref<16x512xbf16, #tpu.memory_space<vmem>>, %arg6: memref<16x512xf32, #tpu.memory_space<vmem>>) attributes {dimension_semantics = [#tpu.dimension_semantics<parallel>, #tpu.dimension_semantics<parallel>, #tpu.dimension_semantics<arbitrary>], iteration_bounds = array<i64: 1, 1, 1>, scalar_prefetch = 0 : i64, scratch_operands = 1 : i64, tpu.core_type = #tpu.core_type<tc>, window_params = [{transform_indices = @transform_0, window_bounds = array<i64: 16, 512>}, {transform_indices = @transform_1, window_bounds = array<i64: 512, 512>}, {transform_indices = @transform_2, window_bounds = array<i64: 16, 512>}]} {
    %c0_i32 = arith.constant 0 : i32
    %0 = arith.cmpi eq, %arg2, %c0_i32 : i32
    %1 = arith.extui %0 : i1 to i32
    %c0_i32_0 = arith.constant 0 : i32
    %2 = arith.cmpi ne, %1, %c0_i32_0 : i32
    scf.if %2 {
      %cst_10 = arith.constant 0.000000e+00 : f32
      %12 = vector.broadcast %cst_10 : f32 to vector<16x512xf32>
      %c0_11 = arith.constant 0 : index
      %c0_12 = arith.constant 0 : index
      %13 = vector.load %arg6[%c0_11, %c0_12] : memref<16x512xf32, #tpu.memory_space<vmem>>, vector<16x512xf32>
      tpu.vector_store %arg6[%c0_11, %c0_12], %12 {strides = array<i32>} : memref<16x512xf32, #tpu.memory_space<vmem>>, vector<16x512xf32>,
    } else {
    }
    %c0 = arith.constant 0 : index
    %c0_1 = arith.constant 0 : index
    %3 = vector.load %arg6[%c0, %c0_1] : memref<16x512xf32, #tpu.memory_space<vmem>>, vector<16x512xf32>
    %c0_2 = arith.constant 0 : index
    %c0_3 = arith.constant 0 : index
    %4 = vector.load %arg3[%c0_2, %c0_3] : memref<16x512xbf16, #tpu.memory_space<vmem>>, vector<16x512xbf16>
    %c0_4 = arith.constant 0 : index
    %c0_5 = arith.constant 0 : index
    %5 = vector.load %arg4[%c0_4, %c0_5] : memref<512x512xbf16, #tpu.memory_space<vmem>>, vector<512x512xbf16>
    %cst = arith.constant dense<0.000000e+00> : vector<16x512xf32>
    %6 = tpu.matmul %4, %5, %cst {dimension_numbers = #tpu.dot_dimension_numbers<[1], [0], [0], [1], [0, 0, 1, 1], [], []>} : vector<16x512xbf16>, vector<512x512xbf16>, vector<16x512xf32> -> vector<16x512xf32>
    %7 = arith.addf %3, %6 : vector<16x512xf32>
    %c0_6 = arith.constant 0 : index
    %c0_7 = arith.constant 0 : index
    %8 = vector.load %arg6[%c0_6, %c0_7] : memref<16x512xf32, #tpu.memory_space<vmem>>, vector<16x512xf32>
    tpu.vector_store %arg6[%c0_6, %c0_7], %7 {strides = array<i32>} : memref<16x512xf32, #tpu.memory_space<vmem>>, vector<16x512xf32>,
    %c0_i32_8 = arith.constant 0 : i32
    %9 = arith.cmpi eq, %arg2, %c0_i32_8 : i32
    %10 = arith.extui %9 : i1 to i32
    %c0_i32_9 = arith.constant 0 : i32
    %11 = arith.cmpi ne, %10, %c0_i32_9 : i32
    scf.if %11 {
      %c0_10 = arith.constant 0 : index
      %c0_11 = arith.constant 0 : index
      %12 = vector.load %arg6[%c0_10, %c0_11] : memref<16x512xf32, #tpu.memory_space<vmem>>, vector<16x512xf32>
      %13 = arith.truncf %12 : vector<16x512xf32> to vector<16x512xbf16>
      %c0_12 = arith.constant 0 : index
      %c0_13 = arith.constant 0 : index
      %14 = vector.load %arg5[%c0_12, %c0_13] : memref<16x512xbf16, #tpu.memory_space<vmem>>, vector<16x512xbf16>
      tpu.vector_store %arg5[%c0_12, %c0_13], %13 {strides = array<i32>} : memref<16x512xbf16, #tpu.memory_space<vmem>>, vector<16x512xbf16>,
    } else {
    }
    return
  }
  func.func @transform_0(%arg0: i32, %arg1: i32, %arg2: i32) -> (i32, i32) {
    %c0_i32 = arith.constant 0 : i32
    return %arg0, %arg2 : i32, i32
  }
  func.func @transform_1(%arg0: i32, %arg1: i32, %arg2: i32) -> (i32, i32) {
    %c0_i32 = arith.constant 0 : i32
    return %arg2, %arg1 : i32, i32
  }
  func.func @transform_2(%arg0: i32, %arg1: i32, %arg2: i32) -> (i32, i32) {
    %c0_i32 = arith.constant 0 : i32
    return %arg0, %arg1 : i32, i32
  }
}

</mosaic_0001>

<bundles_post_ra>
// kernel: tpu_custom_call.1
= control target key start
LH: loop header
LB: loop body
LE: loop exit
PB: predicated region body
PF: predicated region fallthrough
CT: control target
= control target key end

     0   :  { %7 = vsyncpa [#allocation4], 0  ;;  %s1552_s0 = inlined_call_operand.hbm [shape: bf16[16,512], index: 0, kind: input, shape index: {}]   ;;  %s1553_s1 = inlined_call_operand.hbm [shape: bf16[512,512], index: 1, kind: input, shape index: {}]   ;;  %s1554_s2 = inlined_call_operand.hbm [shape: bf16[16,512], index: 2, kind: output, shape index: {}]  }
   0x1   :  { %8 = vsyncpa [#allocation7], 0 }
   0x2   :  { %9 = vsyncpa [#allocation5], 0  ;;  %s1506_s9 = smov [#allocation3]  }
   0x3   :  { %s15_s10 = sshll.u32 %s1506_s9, 4  ;;  %s16_s10 = int_to_ptr.vmem [resolvable:$true] %s15_s10 }
   0x4   :  { %s1448_s11 = scalar_lea.vmem %s16_s10, 512  ;;  %p1453_p1 = scmp.lt.s32.totalorder %s16_s10, %s16_s10 }
   0x5   :  { %p1449_p0 = scmp.ne.s32.totalorder %s16_s10, %s1448_s11  ;;  %p1454_p2 = scmp.lt.s32.totalorder %s1448_s11, %s1448_s11 }
   0x7   :  { %p1455_p3 = por %p1454_p2, %p1453_p1 }
   0x9   :  { %p1456_p4 = pnand %p1455_p3, %p1449_p0 }
   0xb   :  { %1459 = shalt.err (!%p1456_p4)
}
   0xc   :  { %s1507_s12 = smov 256   ;;  %s1508_s13 = smov 16  }
   0xd   :  { %21 = dma.hbm_to_vmem [thread:$0]  %s1552_s0, 512, %s16_s10, [#allocation4], %s1507_s12, %s1507_s12, %s1508_s13  }
   0xe   :  { %s1509_s16 = smov [#allocation6]  }
   0xf   :  { %s27_s17 = sshll.u32 %s1509_s16, 4  ;;  %s28_s17 = int_to_ptr.vmem [resolvable:$true] %s27_s17 }
  0x10   :  { %s1468_s18 = scalar_lea.vmem %s28_s17, 16384  ;;  %p1473_p6 = scmp.lt.s32.totalorder %s28_s17, %s28_s17 }
  0x11   :  { %p1469_p5 = scmp.ne.s32.totalorder %s28_s17, %s1468_s18  ;;  %p1474_p7 = scmp.lt.s32.totalorder %s1468_s18, %s1468_s18 }
  0x13   :  { %p1475_p8 = por %p1474_p7, %p1473_p6 }
  0x15   :  { %p1476_p9 = pnand %p1475_p8, %p1469_p5 }
  0x17   :  { %1479 = shalt.err (!%p1476_p9)
}
  0x18   :  { %33 = dma.hbm_to_vmem [thread:$0]  %s1553_s1, 16384, %s28_s17, [#allocation7], %s1507_s12, %s1507_s12, %s1508_s13  }
  0x19   :  { %1500 = dma.done.wait [#allocation4], 512  }
  0x1a   :  { %1501 = vsyncadd [#allocation4], 4294966784 }
  0x1b   :  { %1502 = dma.done.wait [#allocation7], 16384  }
  0x1c   :  { %1503 = vsyncadd [#allocation7], 4294950912  ;;  %v1242_v0 = vld [vmem:[#allocation6 + $0xe4] ss:$16 sps:$4 sm:$0xff]   ;;  %v1246_v2 = vld [vmem:[#allocation6 + $0xe0] ss:$16 sps:$4 sm:$0xff]  }
  0x1d   :  { %v1244_v1 = vld [vmem:[#allocation6 + $0x2e4] ss:$16 sps:$4 sm:$0xff]   ;;  %852 = vmatprep.subr.bf16.mxu0 %v1242_v0  ;;  %v1247_v3 = vld [vmem:[#allocation6 + $0x2e0] ss:$16 sps:$4 sm:$0xff]   ;;  %v1343_v51 = vld [vmem:[#allocation3 + $0xc] ss:$16 sps:$4 sm:$0xff]  }
  0x1e   :  { %895 = vmatprep.subr.bf16.mxu1 %v1244_v1  ;;  %v1248_v4 = vld [vmem:[#allocation6 + $0xc4] ss:$16 sps:$4 sm:$0xff]   ;;  %853 = vmatpush1.bf16.msra.mxu0 %v1246_v2  ;;  %v1252_v6 = vld [vmem:[#allocation6 + $0xc0] ss:$16 sps:$4 sm:$0xff]   ;;  %v1346_v2 = vld [vmem:[#allocation6 + $0xec] ss:$16 sps:$4 sm:$0xff]  }
  0x1f   :  { %896 = vmatpush1.bf16.msra.mxu1 %v1247_v3  ;;  %v1250_v5 = vld [vmem:[#allocation6 + $0x2c4] ss:$16 sps:$4 sm:$0xff]   ;;  %854 = vmatprep.subr.bf16.mxu0 %v1248_v4  ;;  %v1253_v7 = vld [vmem:[#allocation6 + $0x2c0] ss:$16 sps:$4 sm:$0xff]   ;;  %v1349_v3 = vld [vmem:[#allocation6 + $0x2ec] ss:$16 sps:$4 sm:$0xff]  }
  0x20   :  { %897 = vmatprep.subr.bf16.mxu1 %v1250_v5  ;;  %v1254_v8 = vld [vmem:[#allocation6 + $0xa4] ss:$16 sps:$4 sm:$0xff]   ;;  %v1258_v10 = vld [vmem:[#allocation6 + $0xa0] ss:$16 sps:$4 sm:$0xff]   ;;  %927 = vmatprep.mubr.bf16.mxu1 %v1343_v51  ;;  %v1540_v5 = vld [vmem:[#allocation3 + $0x8] ss:$16 sps:$4 sm:$0xff]  }
  0x21   :  { %v1256_v9 = vld [vmem:[#allocation6 + $0x2a4] ss:$16 sps:$4 sm:$0xff]   ;;  %v1259_v11 = vld [vmem:[#allocation6 + $0x2a0] ss:$16 sps:$4 sm:$0xff]   ;;  %s1510_s0 = smov [#allocation8]  }
  0x22   :  { %855 = vmatpush1.bf16.msra.mxu0 %v1252_v6  ;;  %v1260_v12 = vld [vmem:[#allocation6 + $0x84] ss:$16 sps:$4 sm:$0xff]   ;;  %v1264_v14 = vld [vmem:[#allocation6 + $0x80] ss:$16 sps:$4 sm:$0xff]   ;;  %v1344_v6 = vld [vmem:[#allocation6 + $0xe8] ss:$16 sps:$4 sm:$0xff]  }
  0x23   :  { %898 = vmatpush1.bf16.msra.mxu1 %v1253_v7  ;;  %856 = vmatprep.subr.bf16.mxu0 %v1254_v8  ;;  %v1262_v13 = vld [vmem:[#allocation6 + $0x284] ss:$16 sps:$4 sm:$0xff]   ;;  %v1265_v15 = vld [vmem:[#allocation6 + $0x280] ss:$16 sps:$4 sm:$0xff]   ;;  %v1347_v7 = vld [vmem:[#allocation6 + $0x2e8] ss:$16 sps:$4 sm:$0xff]  }
  0x24   :  { %899 = vmatprep.subr.bf16.mxu1 %v1256_v9  ;;  %v1266_v16 = vld [vmem:[#allocation6 + $0x64] ss:$16 sps:$4 sm:$0xff]   ;;  %v1270_v18 = vld [vmem:[#allocation6 + $0x60] ss:$16 sps:$4 sm:$0xff]   ;;  %v1352_v8 = vld [vmem:[#allocation6 + $0xcc] ss:$16 sps:$4 sm:$0xff]  }
  0x25   :  { %v1268_v17 = vld [vmem:[#allocation6 + $0x264] ss:$16 sps:$4 sm:$0xff]   ;;  %v1271_v19 = vld [vmem:[#allocation6 + $0x260] ss:$16 sps:$4 sm:$0xff]   ;;  %v1355_v9 = vld [vmem:[#allocation6 + $0x2cc] ss:$16 sps:$4 sm:$0xff]  }
  0x26   :  { %857 = vmatpush1.bf16.msra.mxu0 %v1258_v10  ;;  %v1272_v20 = vld [vmem:[#allocation6 + $0x44] ss:$16 sps:$4 sm:$0xff]   ;;  %v1276_v22 = vld [vmem:[#allocation6 + $0x40] ss:$16 sps:$4 sm:$0xff]   ;;  %v1350_v10 = vld [vmem:[#allocation6 + $0xc8] ss:$16 sps:$4 sm:$0xff]  }
  0x27   :  { %900 = vmatpush1.bf16.msra.mxu1 %v1259_v11  ;;  %858 = vmatprep.subr.bf16.mxu0 %v1260_v12  ;;  %v1274_v21 = vld [vmem:[#allocation6 + $0x244] ss:$16 sps:$4 sm:$0xff]   ;;  %v1277_v23 = vld [vmem:[#allocation6 + $0x240] ss:$16 sps:$4 sm:$0xff]   ;;  %v1353_v11 = vld [vmem:[#allocation6 + $0x2c8] ss:$16 sps:$4 sm:$0xff]  }
  0x28   :  { %901 = vmatprep.subr.bf16.mxu1 %v1262_v13  ;;  %v1278_v24 = vld [vmem:[#allocation6 + $0x24] ss:$16 sps:$4 sm:$0xff]   ;;  %v1282_v26 = vld [vmem:[#allocation6 + $0x20] ss:$16 sps:$4 sm:$0xff]   ;;  %v1358_v12 = vld [vmem:[#allocation6 + $0xac] ss:$16 sps:$4 sm:$0xff]  }
  0x29   :  { %v1280_v25 = vld [vmem:[#allocation6 + $0x224] ss:$16 sps:$4 sm:$0xff]   ;;  %v1283_v27 = vld [vmem:[#allocation6 + $0x220] ss:$16 sps:$4 sm:$0xff]   ;;  %v1361_v13 = vld [vmem:[#allocation6 + $0x2ac] ss:$16 sps:$4 sm:$0xff]  }
  0x2a   :  { %859 = vmatpush1.bf16.msra.mxu0 %v1264_v14  ;;  %v1284_v28 = vld [vmem:[#allocation6 + $0x4] ss:$16 sps:$4 sm:$0xff]   ;;  %v1288_v30 = vld [vmem:[#allocation6] ss:$16 sps:$4 sm:$0xff]   ;;  %v1356_v14 = vld [vmem:[#allocation6 + $0xa8] ss:$16 sps:$4 sm:$0xff]  }
  0x2b   :  { %902 = vmatpush1.bf16.msra.mxu1 %v1265_v15  ;;  %860 = vmatprep.subr.bf16.mxu0 %v1266_v16  ;;  %v1286_v29 = vld [vmem:[#allocation6 + $0x204] ss:$16 sps:$4 sm:$0xff]   ;;  %v1289_v31 = vld [vmem:[#allocation6 + $0x200] ss:$16 sps:$4 sm:$0xff]   ;;  %v1359_v15 = vld [vmem:[#allocation6 + $0x2a8] ss:$16 sps:$4 sm:$0xff]  }
  0x2c   :  { %903 = vmatprep.subr.bf16.mxu1 %v1268_v17  ;;  %v1290_v32 = vld [vmem:[#allocation6 + $0x1e4] ss:$16 sps:$4 sm:$0xff]   ;;  %v1294_v34 = vld [vmem:[#allocation6 + $0x1e0] ss:$16 sps:$4 sm:$0xff]   ;;  %v1364_v16 = vld [vmem:[#allocation6 + $0x8c] ss:$16 sps:$4 sm:$0xff]  }
  0x2d   :  { %v1292_v33 = vld [vmem:[#allocation6 + $0x3e4] ss:$16 sps:$4 sm:$0xff]   ;;  %v1295_v35 = vld [vmem:[#allocation6 + $0x3e0] ss:$16 sps:$4 sm:$0xff]   ;;  %v1367_v17 = vld [vmem:[#allocation6 + $0x28c] ss:$16 sps:$4 sm:$0xff]  }
  0x2e   :  { %861 = vmatpush1.bf16.msra.mxu0 %v1270_v18  ;;  %v1296_v36 = vld [vmem:[#allocation6 + $0x1c4] ss:$16 sps:$4 sm:$0xff]   ;;  %v1300_v38 = vld [vmem:[#allocation6 + $0x1c0] ss:$16 sps:$4 sm:$0xff]   ;;  %v1362_v18 = vld [vmem:[#allocation6 + $0x88] ss:$16 sps:$4 sm:$0xff]  }
  0x2f   :  { %904 = vmatpush1.bf16.msra.mxu1 %v1271_v19  ;;  %862 = vmatprep.subr.bf16.mxu0 %v1272_v20  ;;  %v1298_v37 = vld [vmem:[#allocation6 + $0x3c4] ss:$16 sps:$4 sm:$0xff]   ;;  %v1301_v39 = vld [vmem:[#allocation6 + $0x3c0] ss:$16 sps:$4 sm:$0xff]   ;;  %v1365_v19 = vld [vmem:[#allocation6 + $0x288] ss:$16 sps:$4 sm:$0xff]  }
  0x30   :  { %905 = vmatprep.subr.bf16.mxu1 %v1274_v21  ;;  %v1302_v40 = vld [vmem:[#allocation6 + $0x1a4] ss:$16 sps:$4 sm:$0xff]   ;;  %v1306_v42 = vld [vmem:[#allocation6 + $0x1a0] ss:$16 sps:$4 sm:$0xff]   ;;  %v1370_v20 = vld [vmem:[#allocation6 + $0x6c] ss:$16 sps:$4 sm:$0xff]  }
  0x31   :  { %v1304_v41 = vld [vmem:[#allocation6 + $0x3a4] ss:$16 sps:$4 sm:$0xff]   ;;  %v1307_v43 = vld [vmem:[#allocation6 + $0x3a0] ss:$16 sps:$4 sm:$0xff]   ;;  %v1373_v21 = vld [vmem:[#allocation6 + $0x26c] ss:$16 sps:$4 sm:$0xff]  }
  0x32   :  { %863 = vmatpush1.bf16.msra.mxu0 %v1276_v22  ;;  %v1308_v44 = vld [vmem:[#allocation6 + $0x184] ss:$16 sps:$4 sm:$0xff]   ;;  %v1312_v46 = vld [vmem:[#allocation6 + $0x180] ss:$16 sps:$4 sm:$0xff]   ;;  %v1368_v22 = vld [vmem:[#allocation6 + $0x68] ss:$16 sps:$4 sm:$0xff]  }
  0x33   :  { %906 = vmatpush1.bf16.msra.mxu1 %v1277_v23  ;;  %864 = vmatprep.subr.bf16.mxu0 %v1278_v24  ;;  %v1310_v45 = vld [vmem:[#allocation6 + $0x384] ss:$16 sps:$4 sm:$0xff]   ;;  %v1313_v47 = vld [vmem:[#allocation6 + $0x380] ss:$16 sps:$4 sm:$0xff]   ;;  %v1371_v23 = vld [vmem:[#allocation6 + $0x268] ss:$16 sps:$4 sm:$0xff]  }
  0x34   :  { %907 = vmatprep.subr.bf16.mxu1 %v1280_v25  ;;  %v1314_v48 = vld [vmem:[#allocation6 + $0x164] ss:$16 sps:$4 sm:$0xff]   ;;  %v1318_v52 = vld [vmem:[#allocation6 + $0x160] ss:$16 sps:$4 sm:$0xff]   ;;  %v1376_v24 = vld [vmem:[#allocation6 + $0x4c] ss:$16 sps:$4 sm:$0xff]  }
  0x35   :  { %v1340_v49 = vld [vmem:[#allocation3 + $0x4] ss:$16 sps:$4 sm:$0xff]   ;;  %v1319_v53 = vld [vmem:[#allocation6 + $0x360] ss:$16 sps:$4 sm:$0xff]   ;;  %v1379_v25 = vld [vmem:[#allocation6 + $0x24c] ss:$16 sps:$4 sm:$0xff]  }
  0x36   :  { %865 = vmatpush1.bf16.msra.mxu0 %v1282_v26  ;;  %v1316_v50 = vld [vmem:[#allocation6 + $0x364] ss:$16 sps:$4 sm:$0xff]   ;;  %884 = vmatprep.mubr.bf16.mxu0 %v1340_v49  ;;  %v1324_v56 = vld [vmem:[#allocation6 + $0x140] ss:$16 sps:$4 sm:$0xff]   ;;  %v1374_v26 = vld [vmem:[#allocation6 + $0x48] ss:$16 sps:$4 sm:$0xff]  }
  0x37   :  { %908 = vmatpush1.bf16.msra.mxu1 %v1283_v27  ;;  %866 = vmatprep.subr.bf16.mxu0 %v1284_v28  ;;  %v1320_v54 = vld [vmem:[#allocation6 + $0x144] ss:$16 sps:$4 sm:$0xff]   ;;  %v1325_v57 = vld [vmem:[#allocation6 + $0x340] ss:$16 sps:$4 sm:$0xff]   ;;  %v1377_v27 = vld [vmem:[#allocation6 + $0x248] ss:$16 sps:$4 sm:$0xff]  }
  0x38   :  { %909 = vmatprep.subr.bf16.mxu1 %v1286_v29  ;;  %v1322_v55 = vld [vmem:[#allocation6 + $0x344] ss:$16 sps:$4 sm:$0xff]   ;;  %v1330_v60 = vld [vmem:[#allocation6 + $0x120] ss:$16 sps:$4 sm:$0xff]   ;;  %v1382_v28 = vld [vmem:[#allocation6 + $0x2c] ss:$16 sps:$4 sm:$0xff]  }
  0x39   :  { %v1326_v58 = vld [vmem:[#allocation6 + $0x124] ss:$16 sps:$4 sm:$0xff]   ;;  %v1331_v61 = vld [vmem:[#allocation6 + $0x320] ss:$16 sps:$4 sm:$0xff]   ;;  %v1385_v29 = vld [vmem:[#allocation6 + $0x22c] ss:$16 sps:$4 sm:$0xff]  }
  0x3a   :  { %867 = vmatpush1.bf16.msra.mxu0 %v1288_v30  ;;  %v1328_v59 = vld [vmem:[#allocation6 + $0x324] ss:$16 sps:$4 sm:$0xff]   ;;  %v1336_v0 = vld [vmem:[#allocation6 + $0x100] ss:$16 sps:$4 sm:$0xff]   ;;  %v1380_v30 = vld [vmem:[#allocation6 + $0x28] ss:$16 sps:$4 sm:$0xff]  }
  0x3b   :  { %910 = vmatpush1.bf16.msra.mxu1 %v1289_v31  ;;  %868 = vmatprep.subr.bf16.mxu0 %v1290_v32  ;;  %v1332_v62 = vld [vmem:[#allocation6 + $0x104] ss:$16 sps:$4 sm:$0xff]   ;;  %v1337_v1 = vld [vmem:[#allocation6 + $0x300] ss:$16 sps:$4 sm:$0xff]   ;;  %v1383_v31 = vld [vmem:[#allocation6 + $0x228] ss:$16 sps:$4 sm:$0xff]  }
  0x3c   :  { %911 = vmatprep.subr.bf16.mxu1 %v1292_v33  ;;  %v1334_v63 = vld [vmem:[#allocation6 + $0x304] ss:$16 sps:$4 sm:$0xff]   ;;  %v1538_v4 = vld [vmem:[#allocation3] ss:$16 sps:$4 sm:$0xff]   ;;  %v1388_v32 = vld [vmem:[#allocation6 + $0xc] ss:$16 sps:$4 sm:$0xff]  }
  0x3d   :  { %v1391_v33 = vld [vmem:[#allocation6 + $0x20c] ss:$16 sps:$4 sm:$0xff]   ;;  %s1084_s1 = sshll.u32 %s1510_s0, 4  ;;  %s1085_s1 = int_to_ptr.vmem [resolvable:$true] %s1084_s1 }
  0x3e   :  { %869 = vmatpush2.bf16.msra.mxu0 %v1294_v34  ;;  %v1386_v34 = vld [vmem:[#allocation6 + $0x8] ss:$16 sps:$4 sm:$0xff]   ;;  %s1480_s21 = scalar_lea.vmem %s1085_s1, 512  ;;  %p1485_p11 = scmp.lt.s32.totalorder %s1085_s1, %s1085_s1 }
  0x3f   :  { %912 = vmatpush2.bf16.msra.mxu1 %v1295_v35  ;;  %870 = vmatprep.subr.bf16.mxu0 %v1296_v36  ;;  %v1389_v35 = vld [vmem:[#allocation6 + $0x208] ss:$16 sps:$4 sm:$0xff]   ;;  %v1394_v36 = vld [vmem:[#allocation6 + $0x1ec] ss:$16 sps:$4 sm:$0xff]   ;;  %p1481_p10 = scmp.ne.s32.totalorder %s1085_s1, %s1480_s21  ;;  %p1486_p12 = scmp.lt.s32.totalorder %s1480_s21, %s1480_s21 }
  0x40   :  { %913 = vmatprep.subr.bf16.mxu1 %v1298_v37  ;;  %v1397_v37 = vld [vmem:[#allocation6 + $0x3ec] ss:$16 sps:$4 sm:$0xff]  }
  0x41   :  { %p1487_p13 = por %p1486_p12, %p1485_p11 }
  0x42   :  { %871 = vmatpush2.bf16.msra.mxu0 %v1300_v38  ;;  %v1392_v38 = vld [vmem:[#allocation6 + $0x1e8] ss:$16 sps:$4 sm:$0xff]  }
  0x43   :  { %914 = vmatpush2.bf16.msra.mxu1 %v1301_v39  ;;  %872 = vmatprep.subr.bf16.mxu0 %v1302_v40  ;;  %v1395_v39 = vld [vmem:[#allocation6 + $0x3e8] ss:$16 sps:$4 sm:$0xff]   ;;  %v1400_v40 = vld [vmem:[#allocation6 + $0x1cc] ss:$16 sps:$4 sm:$0xff]   ;;  %p1488_p0 = pnand %p1487_p13, %p1481_p10 }
  0x44   :  { %915 = vmatprep.subr.bf16.mxu1 %v1304_v41  ;;  %v1403_v41 = vld [vmem:[#allocation6 + $0x3cc] ss:$16 sps:$4 sm:$0xff]  }
  0x46   :  { %873 = vmatpush2.bf16.msra.mxu0 %v1306_v42  ;;  %v1398_v42 = vld [vmem:[#allocation6 + $0x1c8] ss:$16 sps:$4 sm:$0xff]  }
  0x47   :  { %916 = vmatpush2.bf16.msra.mxu1 %v1307_v43  ;;  %874 = vmatprep.subr.bf16.mxu0 %v1308_v44  ;;  %v1401_v43 = vld [vmem:[#allocation6 + $0x3c8] ss:$16 sps:$4 sm:$0xff]   ;;  %v1406_v44 = vld [vmem:[#allocation6 + $0x1ac] ss:$16 sps:$4 sm:$0xff]  }
  0x48   :  { %917 = vmatprep.subr.bf16.mxu1 %v1310_v45  ;;  %v1409_v45 = vld [vmem:[#allocation6 + $0x3ac] ss:$16 sps:$4 sm:$0xff]  }
  0x4a   :  { %875 = vmatpush2.bf16.msra.mxu0 %v1312_v46  ;;  %v1404_v46 = vld [vmem:[#allocation6 + $0x1a8] ss:$16 sps:$4 sm:$0xff]  }
  0x4b   :  { %918 = vmatpush2.bf16.msra.mxu1 %v1313_v47  ;;  %876 = vmatprep.subr.bf16.mxu0 %v1314_v48  ;;  %v1407_v47 = vld [vmem:[#allocation6 + $0x3a8] ss:$16 sps:$4 sm:$0xff]   ;;  %v1412_v48 = vld [vmem:[#allocation6 + $0x18c] ss:$16 sps:$4 sm:$0xff]  }
  0x4c   :  { %919 = vmatprep.subr.bf16.mxu1 %v1316_v50  ;;  %v1410_v50 = vld [vmem:[#allocation6 + $0x188] ss:$16 sps:$4 sm:$0xff]  }
  0x4e   :  { %877 = vmatpush2.bf16.msra.mxu0 %v1318_v52  ;;  %v1418_v52 = vld [vmem:[#allocation6 + $0x16c] ss:$16 sps:$4 sm:$0xff]  }
  0x4f   :  { %920 = vmatpush2.bf16.msra.mxu1 %v1319_v53  ;;  %878 = vmatprep.subr.bf16.mxu0 %v1320_v54  ;;  %v1421_v53 = vld [vmem:[#allocation6 + $0x36c] ss:$16 sps:$4 sm:$0xff]   ;;  %v1416_v54 = vld [vmem:[#allocation6 + $0x168] ss:$16 sps:$4 sm:$0xff]  }
  0x50   :  { %921 = vmatprep.subr.bf16.mxu1 %v1322_v55  ;;  %v1419_v55 = vld [vmem:[#allocation6 + $0x368] ss:$16 sps:$4 sm:$0xff]  }
  0x52   :  { %879 = vmatpush2.bf16.msra.mxu0 %v1324_v56  ;;  %v1424_v56 = vld [vmem:[#allocation6 + $0x14c] ss:$16 sps:$4 sm:$0xff]  }
  0x53   :  { %922 = vmatpush2.bf16.msra.mxu1 %v1325_v57  ;;  %880 = vmatprep.subr.bf16.mxu0 %v1326_v58  ;;  %v1427_v57 = vld [vmem:[#allocation6 + $0x34c] ss:$16 sps:$4 sm:$0xff]   ;;  %v1422_v58 = vld [vmem:[#allocation6 + $0x148] ss:$16 sps:$4 sm:$0xff]  }
  0x54   :  { %923 = vmatprep.subr.bf16.mxu1 %v1328_v59  ;;  %v1425_v59 = vld [vmem:[#allocation6 + $0x348] ss:$16 sps:$4 sm:$0xff]  }
  0x56   :  { %881 = vmatpush2.bf16.msra.mxu0 %v1330_v60  ;;  %v1430_v60 = vld [vmem:[#allocation6 + $0x12c] ss:$16 sps:$4 sm:$0xff]  }
  0x57   :  { %924 = vmatpush2.bf16.msra.mxu1 %v1331_v61  ;;  %882 = vmatprep.subr.bf16.mxu0 %v1332_v62  ;;  %v1433_v61 = vld [vmem:[#allocation6 + $0x32c] ss:$16 sps:$4 sm:$0xff]   ;;  %v1428_v62 = vld [vmem:[#allocation6 + $0x128] ss:$16 sps:$4 sm:$0xff]  }
  0x58   :  { %925 = vmatprep.subr.bf16.mxu1 %v1334_v63  ;;  %v1431_v63 = vld [vmem:[#allocation6 + $0x328] ss:$16 sps:$4 sm:$0xff]  }
  0x5a   :  { %883 = vmatpush2.bf16.msra.mxu0 %v1336_v0  ;;  %v1436_v0 = vld [vmem:[#allocation6 + $0x10c] ss:$16 sps:$4 sm:$0xff]  }
  0x5b   :  { %926 = vmatpush2.bf16.msra.mxu1 %v1337_v1  ;;  %938 = vmatprep.subr.bf16.mxu0 %v1346_v2  ;;  %v1439_v1 = vld [vmem:[#allocation6 + $0x30c] ss:$16 sps:$4 sm:$0xff]   ;;  %v1434_v2 = vld [vmem:[#allocation6 + $0x108] ss:$16 sps:$4 sm:$0xff]  }
  0x5c   :  { %981 = vmatprep.subr.bf16.mxu1 %v1349_v3  ;;  %v1437_v3 = vld [vmem:[#allocation6 + $0x308] ss:$16 sps:$4 sm:$0xff]  }
  0x5d   :  { %885 = vmatmul.mubr.bf16.vlgmr.msra.gmra.mxu0 %v1538_v4 }
  0x5e   :  { %928 = vmatmul.mubr.bf16.vlgmr.msra.gmra.mxu1 %v1540_v5  ;;  %939 = vmatpush1.bf16.msra.mxu0 %v1344_v6 }
  0x5f   :  { %982 = vmatpush1.bf16.msra.mxu1 %v1347_v7  ;;  %940 = vmatprep.subr.bf16.mxu0 %v1352_v8 }
  0x60   :  { %983 = vmatprep.subr.bf16.mxu1 %v1355_v9  ;;  %970 = vmatprep.mubr.bf16.mxu0 %v1340_v49  ;;  %v1415_v49 = vld [vmem:[#allocation6 + $0x38c] ss:$16 sps:$4 sm:$0xff]  }
  0x61   :  { %1013 = vmatprep.mubr.bf16.mxu1 %v1343_v51  ;;  %v1413_v51 = vld [vmem:[#allocation6 + $0x388] ss:$16 sps:$4 sm:$0xff]  }
  0x62   :  { %941 = vmatpush1.bf16.msra.mxu0 %v1350_v10 }
  0x63   :  { %984 = vmatpush1.bf16.msra.mxu1 %v1353_v11  ;;  %942 = vmatprep.subr.bf16.mxu0 %v1358_v12 }
  0x64   :  { %985 = vmatprep.subr.bf16.mxu1 %v1361_v13 }
  0x66   :  { %943 = vmatpush1.bf16.msra.mxu0 %v1356_v14 }
  0x67   :  { %986 = vmatpush1.bf16.msra.mxu1 %v1359_v15  ;;  %944 = vmatprep.subr.bf16.mxu0 %v1364_v16 }
  0x68   :  { %987 = vmatprep.subr.bf16.mxu1 %v1367_v17 }
  0x6a   :  { %945 = vmatpush1.bf16.msra.mxu0 %v1362_v18 }
  0x6b   :  { %988 = vmatpush1.bf16.msra.mxu1 %v1365_v19  ;;  %946 = vmatprep.subr.bf16.mxu0 %v1370_v20 }
  0x6c   :  { %989 = vmatprep.subr.bf16.mxu1 %v1373_v21 }
  0x6e   :  { %947 = vmatpush1.bf16.msra.mxu0 %v1368_v22 }
  0x6f   :  { %990 = vmatpush1.bf16.msra.mxu1 %v1371_v23  ;;  %948 = vmatprep.subr.bf16.mxu0 %v1376_v24 }
  0x70   :  { %991 = vmatprep.subr.bf16.mxu1 %v1379_v25 }
  0x72   :  { %949 = vmatpush1.bf16.msra.mxu0 %v1374_v26 }
  0x73   :  { %992 = vmatpush1.bf16.msra.mxu1 %v1377_v27  ;;  %950 = vmatprep.subr.bf16.mxu0 %v1382_v28 }
  0x74   :  { %993 = vmatprep.subr.bf16.mxu1 %v1385_v29 }
  0x76   :  { %951 = vmatpush1.bf16.msra.mxu0 %v1380_v30 }
  0x77   :  { %994 = vmatpush1.bf16.msra.mxu1 %v1383_v31  ;;  %952 = vmatprep.subr.bf16.mxu0 %v1388_v32 }
  0x78   :  { %995 = vmatprep.subr.bf16.mxu1 %v1391_v33 }
  0x7a   :  { %953 = vmatpush1.bf16.msra.mxu0 %v1386_v34 }
  0x7b   :  { %996 = vmatpush1.bf16.msra.mxu1 %v1389_v35  ;;  %954 = vmatprep.subr.bf16.mxu0 %v1394_v36 }
  0x7c   :  { %997 = vmatprep.subr.bf16.mxu1 %v1397_v37 }
  0x7e   :  { %955 = vmatpush2.bf16.msra.mxu0 %v1392_v38 }
  0x7f   :  { %998 = vmatpush2.bf16.msra.mxu1 %v1395_v39  ;;  %956 = vmatprep.subr.bf16.mxu0 %v1400_v40 }
  0x80   :  { %999 = vmatprep.subr.bf16.mxu1 %v1403_v41 }
  0x82   :  { %957 = vmatpush2.bf16.msra.mxu0 %v1398_v42 }
  0x83   :  { %1000 = vmatpush2.bf16.msra.mxu1 %v1401_v43  ;;  %958 = vmatprep.subr.bf16.mxu0 %v1406_v44 }
  0x84   :  { %1001 = vmatprep.subr.bf16.mxu1 %v1409_v45 }
  0x86   :  { %959 = vmatpush2.bf16.msra.mxu0 %v1404_v46 }
  0x87   :  { %1002 = vmatpush2.bf16.msra.mxu1 %v1407_v47  ;;  %960 = vmatprep.subr.bf16.mxu0 %v1412_v48 }
  0x88   :  { %1003 = vmatprep.subr.bf16.mxu1 %v1415_v49 }
  0x8a   :  { %961 = vmatpush2.bf16.msra.mxu0 %v1410_v50 }
  0x8b   :  { %1004 = vmatpush2.bf16.msra.mxu1 %v1413_v51  ;;  %962 = vmatprep.subr.bf16.mxu0 %v1418_v52 }
  0x8c   :  { %1005 = vmatprep.subr.bf16.mxu1 %v1421_v53 }
  0x8e   :  { %963 = vmatpush2.bf16.msra.mxu0 %v1416_v54 }
  0x8f   :  { %1006 = vmatpush2.bf16.msra.mxu1 %v1419_v55  ;;  %964 = vmatprep.subr.bf16.mxu0 %v1424_v56 }
  0x90   :  { %1007 = vmatprep.subr.bf16.mxu1 %v1427_v57 }
  0x92   :  { %965 = vmatpush2.bf16.msra.mxu0 %v1422_v58 }
  0x93   :  { %1008 = vmatpush2.bf16.msra.mxu1 %v1425_v59  ;;  %966 = vmatprep.subr.bf16.mxu0 %v1430_v60 }
  0x94   :  { %1009 = vmatprep.subr.bf16.mxu1 %v1433_v61 }
  0x96   :  { %967 = vmatpush2.bf16.msra.mxu0 %v1428_v62 }
  0x97   :  { %1010 = vmatpush2.bf16.msra.mxu1 %v1431_v63  ;;  %968 = vmatprep.subr.bf16.mxu0 %v1436_v0 }
  0x98   :  { %1011 = vmatprep.subr.bf16.mxu1 %v1439_v1 }
  0x9a   :  { %969 = vmatpush2.bf16.msra.mxu0 %v1434_v2 }
  0x9b   :  { %1012 = vmatpush2.bf16.msra.mxu1 %v1437_v3 }
  0x9d   :  { %971 = vmatmul.mubr.bf16.vlgmr.msra.gmra.mxu0 %v1538_v4 }
  0x9e   :  { %1014 = vmatmul.mubr.bf16.vlgmr.msra.gmra.mxu1 %v1540_v5 }
 0x11d   :  { %v886_v6 = vpop.f32.mrf.mxu0 }
 0x11e   :  { %v929_v7 = vpop.f32.mrf.mxu1 }
 0x11f   :  { %v930_v8 = vadd.f32 %v929_v7, %v886_v6  ;;  %v888_v9 = vpop.f32.mrf.mxu0 }
 0x120   :  { %v931_v10 = vpop.f32.mrf.mxu1 }
 0x121   :  { %v932_v11 = vadd.f32 %v931_v10, %v888_v9  ;;  %v890_v12 = vpop.f32.mrf.mxu0 }
 0x122   :  { %v933_v13 = vpop.f32.mrf.mxu1 }
 0x123   :  { %v1233_v14 = vpack.c.bf16 %v932_v11, %v930_v8  ;;  %v892_v15 = vpop.f32.mrf.mxu0  ;;  %v934_v17 = vadd.f32 %v933_v13, %v890_v12 }
 0x124   :  { %v935_v16 = vpop.f32.mrf.mxu1 }
 0x125   :  { %1075 = vst [vmem:[#allocation8] sm:$0xff] %v1233_v14  ;;  %v936_v18 = vadd.f32 %v935_v16, %v892_v15 }
 0x127   :  { %v1235_v19 = vpack.c.bf16 %v936_v18, %v934_v17 }
 0x129   :  { %1077 = vst [vmem:[#allocation8 + $0x10] sm:$0xff] %v1235_v19 }
 0x15d   :  { %v972_v20 = vpop.f32.mrf.mxu0 }
 0x15e   :  { %v1015_v4 = vpop.f32.mrf.mxu1 }
 0x15f   :  { %v974_v21 = vpop.f32.mrf.mxu0  ;;  %v1016_v22 = vadd.f32 %v1015_v4, %v972_v20 }
 0x160   :  { %v1017_v5 = vpop.f32.mrf.mxu1 }
 0x161   :  { %v1018_v23 = vadd.f32 %v1017_v5, %v974_v21  ;;  %v976_v24 = vpop.f32.mrf.mxu0 }
 0x162   :  { %v1019_v25 = vpop.f32.mrf.mxu1 }
 0x163   :  { %v1234_v26 = vpack.c.bf16 %v1018_v23, %v1016_v22  ;;  %v978_v27 = vpop.f32.mrf.mxu0  ;;  %v1020_v29 = vadd.f32 %v1019_v25, %v976_v24 }
 0x164   :  { %v1021_v28 = vpop.f32.mrf.mxu1 }
 0x165   :  { %1076 = vst [vmem:[#allocation8 + $0x8] sm:$0xff] %v1234_v26  ;;  %v1022_v30 = vadd.f32 %v1021_v28, %v978_v27 }
 0x167   :  { %v1236_v31 = vpack.c.bf16 %v1022_v30, %v1020_v29 }
 0x169   :  { %1078 = vst [vmem:[#allocation8 + $0x18] sm:$0xff] %v1236_v31 }
 0x16a   :  { %1491 = shalt.err (!%p1488_p0)
}
 0x16b   :  { %1090 = dma.vmem_to_hbm [thread:$0]  %s1085_s1, 512, %s1554_s2, [#allocation5], %s1507_s12, %s1507_s12, %s1508_s13  }
 0x16c   :  { %1504 = dma.done.wait [#allocation5], 512  }
 0x16d   :  { %1505 = vsyncadd [#allocation5], 4294966784 }
 0x16e   :  { %1094 = vsyncpa [#allocation4], 1 }
 0x16f   :  { %1095 = vsyncpa [#allocation7], 1 }
 0x170   :  { %1096 = vsyncpa [#allocation5], 1 }

</bundles_post_ra>
